<compile_context>
chip_gen: v7x
topology: tpu7x:2x2x1
jax: 0.10.0
libtpu: 0.0.40
codegen_flags: <defaults>
</compile_context>

<pallas_src>
import functools

import numpy as np

import jax
import jax.numpy as jnp
from jax.experimental import pallas as pl
from jax.experimental.pallas import tpu as pltpu

HID = 64     # hidden size of the PyTorch module
HP = 128     # hidden size padded to a full lane width
LIN1 = 32    # lin1 output size


def _round_up(x, m):
    return (x + m - 1) // m * m


def _pick_tile(n, candidates, prefer_multi=False):
    """Largest candidate dividing n; optionally prefer one giving >=2 blocks."""
    divs = [c for c in candidates if n % c == 0]
    if not divs:
        return n
    if prefer_multi:
        for c in divs:
            if n // c >= 2:
                return c
    return divs[0]


def _vmem_limit_bytes():
    # ~3/4 of physical VMEM: ~96 MiB on v5e/v6e (128 MiB), ~48 MiB on v7x
    # (64 MiB).  Conservative fallback if the query is unavailable.
    try:
        cap = pltpu.get_tpu_info().vmem_capacity_bytes
        return int(min(cap * 3 // 4, 96 * 1024 * 1024))
    except Exception:
        return 32 * 1024 * 1024


def _compiler_params(dim_sem):
    return pltpu.CompilerParams(
        dimension_semantics=dim_sem,
        vmem_limit_bytes=_vmem_limit_bytes(),
    )


# ----------------------------------------------------------------------------
# Kernels
# ----------------------------------------------------------------------------
def project_kernel(x_ref, w_ref, o_ref):
    """o = X_block @ W   (the small per-layer feature projection)."""
    o_ref[...] = jnp.dot(
        x_ref[...], w_ref[...], preferred_element_type=jnp.float32
    ).astype(o_ref.dtype)


def pool_head_kernel(p_ref, h_ref, w3_ref, b3_ref, w4_ref, b4_ref,
                     out_ref, acc_ref):
    """pooled = P @ H2 (accumulated over N tiles); MLP head + log_softmax at end."""
    k = pl.program_id(0)

    @pl.when(k == 0)
    def _():
        acc_ref[...] = jnp.zeros_like(acc_ref)

    acc_ref[...] += jnp.dot(
        p_ref[...], h_ref[...], preferred_element_type=jnp.float32
    )

    @pl.when(k == pl.num_programs(0) - 1)
    def _():
        pooled = acc_ref[...]                                            # (Gp, HP)
        z = jnp.dot(pooled, w3_ref[...], preferred_element_type=jnp.float32)
        z = jnp.maximum(z + b3_ref[...], 0.0)                            # (Gp, 32)
        logits = jnp.dot(z, w4_ref[...], preferred_element_type=jnp.float32)
        logits = logits + b4_ref[...]                                    # (Gp, C)
        m = jnp.max(logits, axis=1, keepdims=True)
        s = logits - m
        lse = jnp.log(jnp.sum(jnp.exp(s), axis=1, keepdims=True))
        out_ref[...] = s - lse


# ----------------------------------------------------------------------------
# pallas_call wrappers
# ----------------------------------------------------------------------------
def project(x, w, tm):
    n, fin = x.shape
    hp = w.shape[1]
    return pl.pallas_call(
        project_kernel,
        out_shape=jax.ShapeDtypeStruct((n, hp), jnp.bfloat16),
        grid=(n // tm,),
        in_specs=[pl.BlockSpec((tm, fin), lambda i: (i, 0)),
                  pl.BlockSpec((fin, hp), lambda i: (0, 0))],
        out_specs=pl.BlockSpec((tm, hp), lambda i: (i, 0)),
        compiler_params=_compiler_params(("parallel",)),
    )(x, w)


def aggregate(a, z, b, kstart, kcount, max_k, tm, tk, z_resident):
    """o_rowblock = relu( Â_rowblock @ Z + b ), visiting only the non-zero
    (tm, tk) blocks of Â given by the scalar-prefetched [kstart, kcount]."""
    np_ = a.shape[0]
    hp = z.shape[1]
    nb_r = np_ // tm

    def kernel(ks_ref, kc_ref, a_ref, z_ref, b_ref, o_ref, acc_ref):
        i = pl.program_id(0)
        k = pl.program_id(1)

        @pl.when(k == 0)
        def _():
            acc_ref[...] = jnp.zeros_like(acc_ref)

        # Only accumulate on real (non-padded) k steps of this row block.
        @pl.when(k < kc_ref[i])
        def _():
            if z_resident:
                col = ks_ref[i] + k
                zz = z_ref[pl.ds(pl.multiple_of(col * tk, tk), tk), :]
            else:
                zz = z_ref[...]
            acc_ref[...] += jnp.dot(a_ref[...], zz,
                                    preferred_element_type=jnp.float32)

        @pl.when(k == pl.num_programs(1) - 1)
        def _():
            o_ref[...] = jnp.maximum(acc_ref[...] + b_ref[...], 0.0
                                     ).astype(o_ref.dtype)

    # Â block index: padded k steps clamp to the last real block so the block
    # index is unchanged and Pallas skips the DMA.
    def a_map(i, k, ks, kc):
        return (i, ks[i] + jnp.minimum(k, kc[i] - 1))

    if z_resident:
        # Single resident Z slab; index never changes -> DMA'd once.
        z_spec = pl.BlockSpec((np_, hp), lambda i, k, ks, kc: (0, 0))
    else:
        z_spec = pl.BlockSpec(
            (tk, hp),
            lambda i, k, ks, kc: (ks[i] + jnp.minimum(k, kc[i] - 1), 0))

    grid_spec = pltpu.PrefetchScalarGridSpec(
        num_scalar_prefetch=2,
        grid=(nb_r, max_k),
        in_specs=[pl.BlockSpec((tm, tk), a_map),
                  z_spec,
                  pl.BlockSpec((1, hp), lambda i, k, ks, kc: (0, 0))],
        out_specs=pl.BlockSpec((tm, hp), lambda i, k, ks, kc: (i, 0)),
        scratch_shapes=[pltpu.VMEM((tm, hp), jnp.float32)],
    )
    return pl.pallas_call(
        kernel,
        out_shape=jax.ShapeDtypeStruct((np_, hp), jnp.bfloat16),
        grid_spec=grid_spec,
        compiler_params=_compiler_params(("parallel", "arbitrary")),
    )(kstart, kcount, a, z, b)


def pool_head(p, h, w3, b3, w4, b4, tk):
    gp, n = p.shape
    hp = h.shape[1]
    l1 = w3.shape[1]
    c = w4.shape[1]
    return pl.pallas_call(
        pool_head_kernel,
        out_shape=jax.ShapeDtypeStruct((gp, c), jnp.float32),
        grid=(n // tk,),
        in_specs=[pl.BlockSpec((gp, tk), lambda k: (0, k)),
                  pl.BlockSpec((tk, hp), lambda k: (k, 0)),
                  pl.BlockSpec((hp, l1), lambda k: (0, 0)),
                  pl.BlockSpec((1, l1), lambda k: (0, 0)),
                  pl.BlockSpec((l1, c), lambda k: (0, 0)),
                  pl.BlockSpec((1, c), lambda k: (0, 0))],
        out_specs=pl.BlockSpec((gp, c), lambda k: (0, 0)),
        scratch_shapes=[pltpu.VMEM((gp, hp), jnp.float32)],
        compiler_params=_compiler_params(("arbitrary",)),
    )(p, h, w3, b3, w4, b4)


# ----------------------------------------------------------------------------
# Graph preprocessing (plain JAX / host numpy)
# ----------------------------------------------------------------------------
def build_norm_adjacency(edge_index, num_nodes, padded_nodes):
    """Dense D^-1/2 (A + I) D^-1/2, built directly at the padded size.
    Padded rows/cols are exactly zero."""
    src, dst = edge_index[0], edge_index[1]
    ids = jnp.arange(num_nodes)
    a = jnp.zeros((padded_nodes, padded_nodes), jnp.float32)
    a = a.at[src, dst].set(1.0)
    a = a.at[dst, src].set(1.0)                      # undirected
    a = a.at[ids, ids].set(1.0)                      # self-loops (valid nodes only)
    deg = jnp.sum(a, axis=1)
    inv_sqrt = jnp.where(deg > 0.0,
                         jax.lax.rsqrt(jnp.maximum(deg, 1.0)), 0.0)
    return a * inv_sqrt[:, None] * inv_sqrt[None, :]


def build_mean_pool(batch, num_graphs, padded_graphs, padded_nodes):
    """(Gp, Np) matrix implementing global_mean_pool (padded rows/cols zero)."""
    n = batch.shape[0]
    onehot = (batch[None, :] == jnp.arange(num_graphs)[:, None]).astype(jnp.float32)
    counts = jnp.maximum(onehot.sum(axis=1, keepdims=True), 1.0)
    pool = onehot / counts
    return jnp.pad(pool, ((0, padded_graphs - num_graphs),
                          (0, padded_nodes - n)))


def build_block_schedule(edge_index, num_nodes, padded_nodes, tm, tk):
    """Host-side (numpy) per-row-block non-zero column-block range of Â.

    Returns int32 arrays kstart[nb_r], kcount[nb_r] and the static max_k used
    as the contraction grid extent.  Requires a concrete edge_index (this
    wrapper is called eagerly; under jit, precompute the schedule outside)."""
    ei = np.asarray(jax.device_get(edge_index))
    src = ei[0].astype(np.int64)
    dst = ei[1].astype(np.int64)
    loops = np.arange(num_nodes, dtype=np.int64)
    rows = np.concatenate([src, dst, loops])
    cols = np.concatenate([dst, src, loops])

    nb_r = padded_nodes // tm
    nb_k = padded_nodes // tk
    rb = rows // tm
    kmin = np.full((nb_r,), padded_nodes, dtype=np.int64)
    kmax = np.full((nb_r,), -1, dtype=np.int64)
    np.minimum.at(kmin, rb, cols)
    np.maximum.at(kmax, rb, cols)

    empty = kmax < 0                                  # fully-padded row blocks
    kstart = np.where(empty, 0, kmin // tk)
    kend = np.where(empty, 0, kmax // tk)
    kstart = np.clip(kstart, 0, nb_k - 1)
    kend = np.clip(kend, kstart, nb_k - 1)
    kcount = kend - kstart + 1                        # always >= 1
    max_k = int(kcount.max())
    return (jnp.asarray(kstart, jnp.int32),
            jnp.asarray(kcount, jnp.int32),
            max_k)


# ----------------------------------------------------------------------------
# Full forward
# ----------------------------------------------------------------------------
def protein_gcn_forward(x, edge_index, batch, params, num_graphs):
    w1, b1, w2, b2, w3, b3, w4, b4 = params
    n, fin = x.shape

    # Padded sizes / tiles.  Large graphs get big (up to 512 x 2048) Â tiles
    # to amortize per-grid-step overhead; the row-block axis prefers >=2
    # blocks so ("parallel", ...) can shard across TensorCores.
    np_ = _round_up(n, 128) if n <= 2048 else _round_up(n, 512)
    gp = _round_up(num_graphs, 8)
    fin_p = _round_up(fin, 128)
    tm = _pick_tile(np_, (512, 256, 128), prefer_multi=True)
    tk = _pick_tile(np_, (2048, 1024, 512, 256, 128))
    # Resident Z (double-buffered bf16) only while it stays a few MiB.
    z_resident = np_ * HP * 2 * 2 <= 8 * 1024 * 1024

    # Graph glue (degrees / counts use the PRE-padding node set).
    a_p = build_norm_adjacency(edge_index, n, np_).astype(jnp.bfloat16)
    pool_p = build_mean_pool(batch, num_graphs, gp, np_).astype(jnp.bfloat16)
    kstart, kcount, max_k = build_block_schedule(edge_index, n, np_, tm, tk)

    # Pad features / weights (zero rows & cols => padded lanes never contribute)
    # and cast the streamed operands to bf16 (f32 MXU accumulation in-kernel).
    x_p = jnp.pad(x, ((0, np_ - n), (0, fin_p - fin))).astype(jnp.bfloat16)
    w1_p = jnp.pad(w1, ((0, fin_p - fin), (0, HP - HID))).astype(jnp.bfloat16)
    b1_p = jnp.pad(b1, ((0, 0), (0, HP - HID)))
    w2_p = jnp.pad(w2, ((0, HP - HID), (0, HP - HID))).astype(jnp.bfloat16)
    b2_p = jnp.pad(b2, ((0, 0), (0, HP - HID)))
    w3_p = jnp.pad(w3, ((0, HP - HID), (0, 0)))

    # conv1 (reassociated): relu( Â (X W1) + b1 )
    z1 = project(x_p, w1_p, tm)
    h1 = aggregate(a_p, z1, b1_p, kstart, kcount, max_k, tm, tk, z_resident)
    # conv2: relu( Â (H1 W2) + b2 )
    z2 = project(h1, w2_p, tm)
    h2 = aggregate(a_p, z2, b2_p, kstart, kcount, max_k, tm, tk, z_resident)
    # global_mean_pool + lin1/ReLU + lin2 + log_softmax
    out = pool_head(pool_p, h2, w3_p, b3, w4, b4, tk)
    return out[:num_graphs]


# ----------------------------------------------------------------------------
# Reference (pure JAX, f32) and parameter init
# ----------------------------------------------------------------------------
def reference_forward(x, edge_index, batch, params, num_graphs):
    w1, b1, w2, b2, w3, b3, w4, b4 = params
    n = x.shape[0]
    a = build_norm_adjacency(edge_index, n, n)
    pool = build_mean_pool(batch, num_graphs, num_graphs, n)
    h1 = jnp.maximum(a @ (x @ w1) + b1, 0.0)
    h2 = jnp.maximum(a @ (h1 @ w2) + b2, 0.0)
    pooled = pool @ h2
    z = jnp.maximum(pooled @ w3 + b3, 0.0)
    logits = z @ w4 + b4
    return jax.nn.log_softmax(logits, axis=1)


def init_params(key, num_node_features, num_classes):
    ks = jax.random.split(key, 6)

    def dense(k, fan_in, fan_out):
        scale = 1.0 / jnp.sqrt(jnp.float32(fan_in))
        return jax.random.uniform(k, (fan_in, fan_out), jnp.float32, -scale, scale)

    w1 = dense(ks[0], num_node_features, HID)
    b1 = jnp.zeros((1, HID), jnp.float32)
    w2 = dense(ks[1], HID, HID)
    b2 = jnp.zeros((1, HID), jnp.float32)
    w3 = dense(ks[2], HID, LIN1)
    b3 = jax.random.uniform(ks[3], (1, LIN1), jnp.float32, -0.1, 0.1)
    w4 = dense(ks[4], LIN1, num_classes)
    b4 = jax.random.uniform(ks[5], (1, num_classes), jnp.float32, -0.1, 0.1)
    return (w1, b1, w2, b2, w3, b3, w4, b4)


if __name__ == "__main__":
    key = jax.random.PRNGKey(0)
    k_x, k_e, k_p = jax.random.split(key, 3)

    NUM_NODES = 32          # total nodes across the batch of graphs
    NUM_FEATS = 8           # dataset.num_node_features (synthetic)
    NUM_CLASSES = 2         # dataset.num_classes (synthetic)
    NUM_GRAPHS = 2          # batch of 2 graphs
    NUM_EDGES = 64

    # node features
    x = jax.random.normal(k_x, (NUM_NODES, NUM_FEATS), jnp.float32)

    # random edges, kept within each graph's node range (block-diagonal Â)
    half = NUM_NODES // 2
    e0 = jax.random.randint(k_e, (2, NUM_EDGES // 2), 0, half)
    e1 = jax.random.randint(jax.random.fold_in(k_e, 1), (2, NUM_EDGES // 2),
                            half, NUM_NODES)
    edge_index = jnp.concatenate([e0, e1], axis=1).astype(jnp.int32)   # (2, 64)

    # graph assignment vector (global_mean_pool's `batch`)
    batch = jnp.concatenate([jnp.zeros((half,), jnp.int32),
                             jnp.ones((half,), jnp.int32)])

    params = init_params(k_p, NUM_FEATS, NUM_CLASSES)

    out = protein_gcn_forward(x, edge_index, batch, params, NUM_GRAPHS)
    out = jax.block_until_ready(out)

    assert out.shape == (NUM_GRAPHS, NUM_CLASSES)
    # log_softmax rows must (approximately) exp-sum to 1
    assert jnp.allclose(jnp.sum(jnp.exp(out), axis=1), 1.0, atol=1e-5)
    # bf16-streamed kernel vs f32 reference (generous tol for bf16 operands)
    ref = reference_forward(x, edge_index, batch, params, NUM_GRAPHS)
    assert jnp.allclose(out, ref, atol=5e-2, rtol=5e-2)
    print("KERNEL_OK")
</pallas_src>

<mosaic_0001>
module attributes {stable_mosaic.version = 11 : i64} {
  func.func @project_kernel(%arg0: i32, %arg1: memref<128x128xbf16, #tpu.memory_space<vmem>>, %arg2: memref<128x128xbf16, #tpu.memory_space<vmem>>, %arg3: memref<128x128xbf16, #tpu.memory_space<vmem>>) attributes {dimension_semantics = [#tpu.dimension_semantics<parallel>], iteration_bounds = array<i64: 1>, scalar_prefetch = 0 : i64, scratch_operands = 0 : i64, tpu.core_type = #tpu.core_type<tc>, window_params = [{transform_indices = @transform_0, window_bounds = array<i64: 128, 128>}, {pipeline_mode = #tpu.pipeline_mode<synchronous>, transform_indices = @transform_1, window_bounds = array<i64: 128, 128>}, {transform_indices = @transform_2, window_bounds = array<i64: 128, 128>}]} {
    %c0 = arith.constant 0 : index
    %c0_0 = arith.constant 0 : index
    %0 = vector.load %arg1[%c0, %c0_0] : memref<128x128xbf16, #tpu.memory_space<vmem>>, vector<128x128xbf16>
    %c0_1 = arith.constant 0 : index
    %c0_2 = arith.constant 0 : index
    %1 = vector.load %arg2[%c0_1, %c0_2] : memref<128x128xbf16, #tpu.memory_space<vmem>>, vector<128x128xbf16>
    %cst = arith.constant dense<0.000000e+00> : vector<128x128xf32>
    %2 = tpu.matmul %0, %1, %cst {dimension_numbers = #tpu.dot_dimension_numbers<[1], [0], [0], [1], [0, 0, 1, 1], [], []>} : vector<128x128xbf16>, vector<128x128xbf16>, vector<128x128xf32> -> vector<128x128xf32>
    %3 = arith.truncf %2 : vector<128x128xf32> to vector<128x128xbf16>
    %c0_3 = arith.constant 0 : index
    %c0_4 = arith.constant 0 : index
    %4 = vector.load %arg3[%c0_3, %c0_4] : memref<128x128xbf16, #tpu.memory_space<vmem>>, vector<128x128xbf16>
    tpu.vector_store %arg3[%c0_3, %c0_4], %3 {strides = array<i32>} : memref<128x128xbf16, #tpu.memory_space<vmem>>, vector<128x128xbf16>,
    return
  }
  func.func @transform_0(%arg0: i32) -> (i32, i32) {
    %c0_i32 = arith.constant 0 : i32
    %c0_i32_0 = arith.constant 0 : i32
    return %arg0, %c0_i32 : i32, i32
  }
  func.func @transform_1(%arg0: i32) -> (i32, i32) {
    %c0_i32 = arith.constant 0 : i32
    %c0_i32_0 = arith.constant 0 : i32
    %c0_i32_1 = arith.constant 0 : i32
    return %c0_i32, %c0_i32_0 : i32, i32
  }
  func.func @transform_2(%arg0: i32) -> (i32, i32) {
    %c0_i32 = arith.constant 0 : i32
    %c0_i32_0 = arith.constant 0 : i32
    return %arg0, %c0_i32 : i32, i32
  }
}

</mosaic_0001>

<bundles_post_ra>
// kernel: tpu_custom_call.1
= control target key start
LH: loop header
LB: loop body
LE: loop exit
PB: predicated region body
PF: predicated region fallthrough
CT: control target
= control target key end

     0   :  { %7 = vsyncpa [#allocation3], 0  ;;  %s681_s0 = inlined_call_operand.hbm [shape: bf16[128,128], index: 0, kind: input, shape index: {}]   ;;  %s682_s1 = inlined_call_operand.hbm [shape: bf16[128,128], index: 1, kind: input, shape index: {}]   ;;  %s683_s2 = inlined_call_operand.hbm [shape: bf16[128,128], index: 2, kind: output, shape index: {}]  }
   0x1   :  { %8 = vsyncpa [#allocation6], 0 }
   0x2   :  { %9 = vsyncpa [#allocation4], 0  ;;  %s616_s9 = smov [#allocation2]   ;;  %s544_s13 = scalar_lea.hbm %s681_s0, 1024 }
   0x3   :  { %s15_s10 = sshll.u32 %s616_s9, 4  ;;  %p545_p0 = scmp.ne.s32.totalorder %s681_s0, %s544_s13  ;;  %s16_s10 = int_to_ptr.vmem [resolvable:$true] %s15_s10 }
   0x4   :  { %p548_p1 = scmp.lt.u32.totalorder %s544_s13, %s681_s0 }
   0x6   :  { %p550_p2 = pnand %p548_p1, %p545_p0 }
   0x8   :  { %553 = shalt.err (!%p550_p2)
}
   0x9   :  { %s554_s18 = scalar_lea.vmem %s16_s10, 1024  ;;  %p559_p4 = scmp.lt.s32.totalorder %s16_s10, %s16_s10 }
   0xa   :  { %p555_p3 = scmp.ne.s32.totalorder %s16_s10, %s554_s18  ;;  %p560_p5 = scmp.lt.s32.totalorder %s554_s18, %s554_s18 }
   0xc   :  { %p561_p6 = por %p560_p5, %p559_p4 }
   0xe   :  { %p562_p7 = pnand %p561_p6, %p555_p3 }
  0x10   :  { %565 = shalt.err (!%p562_p7)
}
  0x11   :  { %s617_s19 = smov 64   ;;  %s618_s20 = smov 4  }
  0x12   :  { %21 = dma.hbm_to_vmem [thread:$0]  %s681_s0, 1024, %s16_s10, [#allocation3], %s617_s19, %s617_s19, %s618_s20  }
  0x13   :  { %s619_s23 = smov [#allocation5]   ;;  %s566_s27 = scalar_lea.hbm %s682_s1, 1024 }
  0x14   :  { %s27_s24 = sshll.u32 %s619_s23, 4  ;;  %p567_p8 = scmp.ne.s32.totalorder %s682_s1, %s566_s27  ;;  %s28_s24 = int_to_ptr.vmem [resolvable:$true] %s27_s24 }
  0x15   :  { %p570_p9 = scmp.lt.u32.totalorder %s566_s27, %s682_s1 }
  0x17   :  { %p572_p10 = pnand %p570_p9, %p567_p8 }
  0x19   :  { %575 = shalt.err (!%p572_p10)
}
  0x1a   :  { %s576_s4 = scalar_lea.vmem %s28_s24, 1024  ;;  %p581_p12 = scmp.lt.s32.totalorder %s28_s24, %s28_s24 }
  0x1b   :  { %p577_p11 = scmp.ne.s32.totalorder %s28_s24, %s576_s4  ;;  %p582_p13 = scmp.lt.s32.totalorder %s576_s4, %s576_s4 }
  0x1d   :  { %p583_p0 = por %p582_p13, %p581_p12 }
  0x1f   :  { %p584_p1 = pnand %p583_p0, %p577_p11 }
  0x21   :  { %587 = shalt.err (!%p584_p1)
}
  0x22   :  { %33 = dma.hbm_to_vmem [thread:$0]  %s682_s1, 1024, %s28_s24, [#allocation6], %s617_s19, %s617_s19, %s618_s20  }
  0x23   :  { %610 = dma.done.wait [#allocation3], 1024  }
  0x24   :  { %611 = vsyncadd [#allocation3], 4294966272 }
  0x25   :  { %612 = dma.done.wait [#allocation6], 1024  }
  0x26   :  { %613 = vsyncadd [#allocation6], 4294966272  ;;  %v528_v0 = vld [vmem:[#allocation5] sm:$0xff]   ;;  %v529_v1 = vld [vmem:[#allocation5 + $0x8] sm:$0xff]   ;;  %s620_s1 = smov [#allocation7]  }
  0x27   :  { %475 = vmatprep.subr.bf16.mxu0 %v528_v0  ;;  %507 = vmatprep.subr.bf16.mxu1 %v528_v0  ;;  %v530_v2 = vld [vmem:[#allocation5 + $0x10] sm:$0xff]   ;;  %v531_v3 = vld [vmem:[#allocation5 + $0x18] sm:$0xff]   ;;  %v536_v4 = vld [vmem:[#allocation2] sm:$0xff]   ;;  %s351_s6 = sshll.u32 %s620_s1, 4  ;;  %s352_s6 = int_to_ptr.vmem [resolvable:$true] %s351_s6 }
  0x28   :  { %476 = vmatpush3.bf16.msra.mxu0 %v528_v0  ;;  %515 = vmatpush3.bf16.msra.mxu1 %v528_v0  ;;  %v537_v5 = vld [vmem:[#allocation2 + $0x20] sm:$0xff]   ;;  %v533_v7 = vld [vmem:[#allocation5 + $0x28] sm:$0xff]   ;;  %v534_v8 = vld [vmem:[#allocation5 + $0x30] sm:$0xff]   ;;  %s588_s7 = scalar_lea.vmem %s352_s6, 1024  ;;  %p593_p3 = scmp.lt.s32.totalorder %s352_s6, %s352_s6 }
  0x29   :  { %477 = vmatprep.subr.bf16.mxu0 %v529_v1  ;;  %508 = vmatprep.subr.bf16.mxu1 %v529_v1  ;;  %v532_v6 = vld [vmem:[#allocation5 + $0x20] sm:$0xff]   ;;  %v535_v9 = vld [vmem:[#allocation5 + $0x38] sm:$0xff]   ;;  %v538_v10 = vld [vmem:[#allocation2 + $0x8] sm:$0xff]   ;;  %p589_p2 = scmp.ne.s32.totalorder %s352_s6, %s588_s7  ;;  %p594_p4 = scmp.lt.s32.totalorder %s588_s7, %s588_s7 }
  0x2a   :  { %491 = vmatprep.mubr.bf16.mxu0 %v536_v4  ;;  %499 = vmatprep.mubr.bf16.mxu1 %v537_v5  ;;  %v539_v11 = vld [vmem:[#allocation2 + $0x28] sm:$0xff]   ;;  %v540_v12 = vld [vmem:[#allocation2 + $0x10] sm:$0xff]   ;;  %v542_v14 = vld [vmem:[#allocation2 + $0x18] sm:$0xff]  }
  0x2b   :  { %v541_v13 = vld [vmem:[#allocation2 + $0x30] sm:$0xff]   ;;  %v543_v15 = vld [vmem:[#allocation2 + $0x38] sm:$0xff]   ;;  %p595_p5 = por %p594_p4, %p593_p3 }
  0x2c   :  { %478 = vmatpush3.bf16.msra.mxu0 %v529_v1  ;;  %516 = vmatpush3.bf16.msra.mxu1 %v529_v1 }
  0x2d   :  { %479 = vmatprep.subr.bf16.mxu0 %v530_v2  ;;  %509 = vmatprep.subr.bf16.mxu1 %v530_v2  ;;  %p596_p6 = pnand %p595_p5, %p589_p2 }
  0x30   :  { %480 = vmatpush3.bf16.msra.mxu0 %v530_v2  ;;  %517 = vmatpush3.bf16.msra.mxu1 %v530_v2 }
  0x31   :  { %481 = vmatprep.subr.bf16.mxu0 %v531_v3  ;;  %510 = vmatprep.subr.bf16.mxu1 %v531_v3 }
  0x34   :  { %482 = vmatpush3.bf16.msra.mxu0 %v531_v3  ;;  %518 = vmatpush3.bf16.msra.mxu1 %v531_v3 }
  0x35   :  { %483 = vmatprep.subr.bf16.mxu0 %v532_v6  ;;  %511 = vmatprep.subr.bf16.mxu1 %v532_v6 }
  0x38   :  { %484 = vmatpush3.bf16.msra.mxu0 %v532_v6  ;;  %519 = vmatpush3.bf16.msra.mxu1 %v532_v6 }
  0x39   :  { %485 = vmatprep.subr.bf16.mxu0 %v533_v7  ;;  %512 = vmatprep.subr.bf16.mxu1 %v533_v7 }
  0x3c   :  { %486 = vmatpush3.bf16.msra.mxu0 %v533_v7  ;;  %520 = vmatpush3.bf16.msra.mxu1 %v533_v7 }
  0x3d   :  { %487 = vmatprep.subr.bf16.mxu0 %v534_v8  ;;  %513 = vmatprep.subr.bf16.mxu1 %v534_v8 }
  0x40   :  { %488 = vmatpush3.bf16.msra.mxu0 %v534_v8  ;;  %521 = vmatpush3.bf16.msra.mxu1 %v534_v8 }
  0x41   :  { %489 = vmatprep.subr.bf16.mxu0 %v535_v9  ;;  %514 = vmatprep.subr.bf16.mxu1 %v535_v9 }
  0x44   :  { %490 = vmatpush3.bf16.msra.mxu0 %v535_v9  ;;  %522 = vmatpush3.bf16.msra.mxu1 %v535_v9 }
  0x47   :  { %492 = vmatmul.mubr.bf16.vlgmr.msra.gmra.mrb[0].mxu0 %v538_v10  ;;  %500 = vmatmul.mubr.bf16.vlgmr.msra.gmra.mrb[0].mxu1 %v539_v11 }
  0x48   :  { %495 = vmatprep.mubr.bf16.mxu0 %v540_v12  ;;  %503 = vmatprep.mubr.bf16.mxu1 %v541_v13 }
  0x4f   :  { %496 = vmatmul.mubr.bf16.gmra.mrb[4].mxu0 %v542_v14  ;;  %504 = vmatmul.mubr.bf16.gmra.mrb[4].mxu1 %v543_v15 }
 0x11a   :  { %v493_v16 = vpop.f32.mrb[0].mxu0  ;;  %v501_v17 = vpop.f32.mrb[0].mxu1 }
 0x11b   :  { %v203_v18 = vpop.f32.mrb[1].mxu0  ;;  %v235_v19 = vpop.f32.mrb[1].mxu1 }
 0x11c   :  { %v494_v20 = vpop.f32.mrb[2].mxu0  ;;  %v502_v21 = vpop.f32.mrb[2].mxu1 }
 0x11d   :  { %v420_v22 = vpack.c.bf16 %v494_v20, %v493_v16  ;;  %v440_v23 = vpack.c.bf16 %v502_v21, %v501_v17  ;;  %v206_v24 = vpop.f32.mrb[3].mxu0  ;;  %v238_v25 = vpop.f32.mrb[3].mxu1 }
 0x11e   :  { %v415_v26 = vpack.c.bf16 %v206_v24, %v203_v18  ;;  %v435_v27 = vpack.c.bf16 %v238_v25, %v235_v19 }
 0x11f   :  { %452 = vst [vmem:[#allocation7 + $0x8] sm:$0xff] %v420_v22   ;;  %456 = vst [vmem:[#allocation7 + $0x28] sm:$0xff] %v440_v23  }
 0x120   :  { %416 = vst [vmem:[#allocation7] sm:$0xff] %v415_v26   ;;  %455 = vst [vmem:[#allocation7 + $0x20] sm:$0xff] %v435_v27  }
 0x122   :  { %v497_v28 = vpop.f32.mrb[4].mxu0  ;;  %v505_v29 = vpop.f32.mrb[4].mxu1 }
 0x123   :  { %v219_v30 = vpop.f32.mrb[5].mxu0  ;;  %v251_v31 = vpop.f32.mrb[5].mxu1 }
 0x124   :  { %v498_v32 = vpop.f32.mrb[6].mxu0  ;;  %v506_v33 = vpop.f32.mrb[6].mxu1 }
 0x125   :  { %v430_v34 = vpack.c.bf16 %v498_v32, %v497_v28  ;;  %v450_v35 = vpack.c.bf16 %v506_v33, %v505_v29  ;;  %v222_v36 = vpop.f32.mrb[7].mxu0  ;;  %v254_v37 = vpop.f32.mrb[7].mxu1 }
 0x126   :  { %v425_v38 = vpack.c.bf16 %v222_v36, %v219_v30  ;;  %v445_v39 = vpack.c.bf16 %v254_v37, %v251_v31 }
 0x127   :  { %454 = vst [vmem:[#allocation7 + $0x18] sm:$0xff] %v430_v34   ;;  %458 = vst [vmem:[#allocation7 + $0x38] sm:$0xff] %v450_v35  }
 0x128   :  { %453 = vst [vmem:[#allocation7 + $0x10] sm:$0xff] %v425_v38   ;;  %457 = vst [vmem:[#allocation7 + $0x30] sm:$0xff] %v445_v39  }
 0x129   :  { %599 = shalt.err (!%p596_p6)
}
 0x12a   :  { %s600_s10 = scalar_lea.hbm %s683_s2, 1024 }
 0x12b   :  { %p601_p7 = scmp.ne.s32.totalorder %s683_s2, %s600_s10  ;;  %p604_p8 = scmp.lt.u32.totalorder %s600_s10, %s683_s2 }
 0x12d   :  { %p606_p9 = pnand %p604_p8, %p601_p7 }
 0x12f   :  { %609 = shalt.err (!%p606_p9)
}
 0x130   :  { %357 = dma.vmem_to_hbm [thread:$0]  %s352_s6, 1024, %s683_s2, [#allocation4], %s617_s19, %s617_s19, %s618_s20  }
 0x131   :  { %614 = dma.done.wait [#allocation4], 1024  }
 0x132   :  { %615 = vsyncadd [#allocation4], 4294966272 }
 0x133   :  { %361 = vsyncpa [#allocation3], 1 }
 0x134   :  { %362 = vsyncpa [#allocation6], 1 }
 0x135   :  { %363 = vsyncpa [#allocation4], 1 }

</bundles_post_ra>
